<compile_context>
chip_gen: v5e
topology: v5e:2x2
jax: 0.10.0
libtpu: 0.0.40
codegen_flags: <defaults>
</compile_context>

<pallas_src>
import functools

import jax
import jax.numpy as jnp
from jax.experimental import pallas as pl
from jax.experimental.pallas import tpu as pltpu


def _leaky_relu(v, slope=0.2):
    return jnp.where(v > 0, v, slope * v)


def _layernorm(v, gamma, beta, eps=1e-5):
    # single-pass statistics: E[x], E[x^2]
    m = jnp.mean(v, axis=-1, keepdims=True)
    m2 = jnp.mean(v * v, axis=-1, keepdims=True)
    var = m2 - m * m
    return (v - m) * jax.lax.rsqrt(var + eps) * gamma + beta


def _round_up(n, m):
    return ((n + m - 1) // m) * m


# Row order of the packed bias / LN-param slab (built in the wrapper, sliced
# statically in the kernel).
#   0: eb1   1: eb2   2: g1    3: bb1   4: mvb (mu|logvar bias)
#   5: db1   6: db2   7: g2    8: bb2   9: db3
def vae_kernel(
    # batch-tiled inputs (bf16)
    x_ref, eps_ref,
    # resident matmul weights (bf16, constant index_map -> stay in VMEM)
    ew1_ref, ew2_ref, mvw_ref, dw1_ref, dw2_ref, dw3_ref,
    # packed bias / LN-param slab (f32, [10, max_width])
    bias_ref,
    # single lane-dense bf16 output slab [TB, pad128(D+2L)] = recon|mu|logvar|0
    out_ref,
    *, pad_cols,
):
    f32 = jnp.float32

    # Upcast everything to f32 on load (v5e VPU/EUP have no bf16 path); the
    # casts ride otherwise-idle VPU slots and the weights are tiny.
    x = x_ref[...].astype(f32)
    eps = eps_ref[...].astype(f32)
    ew1 = ew1_ref[...].astype(f32)
    ew2 = ew2_ref[...].astype(f32)
    mvw = mvw_ref[...].astype(f32)
    dw1 = dw1_ref[...].astype(f32)
    dw2 = dw2_ref[...].astype(f32)
    dw3 = dw3_ref[...].astype(f32)

    H = ew1.shape[1]
    h2 = ew2.shape[1]
    L2 = mvw.shape[1]          # 2 * latent_dim
    L = L2 // 2
    D = dw3.shape[1]

    b = bias_ref[...]
    eb1 = b[0:1, :H]
    eb2 = b[1:2, :h2]
    g1 = b[2:3, :h2]
    bb1 = b[3:4, :h2]
    mvb = b[4:5, :L2]
    db1 = b[5:6, :h2]
    db2 = b[6:7, :H]
    g2 = b[7:8, :H]
    bb2 = b[8:9, :H]
    db3 = b[9:10, :D]

    # ---- encoder ----
    h = _leaky_relu(jnp.dot(x, ew1, preferred_element_type=f32) + eb1)
    h = jnp.dot(h, ew2, preferred_element_type=f32) + eb2
    h = _leaky_relu(_layernorm(h, g1, bb1))

    # ---- fused latent heads: one matmul -> [TB, 2L] ----
    ml = jnp.dot(h, mvw, preferred_element_type=f32) + mvb
    mu = ml[:, :L]
    logvar = ml[:, L:]

    # ---- reparameterize ----
    # TODO(synk): module draws eps with torch.randn_like inside forward; we
    # pass eps from the host for determinism (pltpu.prng_* is an option that
    # would also drop ~20% of the input HBM bytes).
    z = mu + eps * jnp.exp(0.5 * logvar)

    # ---- decoder ----
    d = _leaky_relu(jnp.dot(z, dw1, preferred_element_type=f32) + db1)
    d = jnp.dot(d, dw2, preferred_element_type=f32) + db2
    d = _leaky_relu(_layernorm(d, g2, bb2))
    recon = jax.nn.sigmoid(jnp.dot(d, dw3, preferred_element_type=f32) + db3)

    # ---- single wide, lane-dense store (bf16 slab) ----
    pieces = [recon, ml]
    if pad_cols:
        pieces.append(jnp.zeros((recon.shape[0], pad_cols), f32))
    out_ref[...] = jnp.concatenate(pieces, axis=-1).astype(out_ref.dtype)


def vae_forward(x, eps, params):
    """Full VAE forward pass in one Pallas call, batch-tiled over a grid."""
    B, D = x.shape
    L = eps.shape[1]
    H = params["ew1"].shape[1]
    h2 = params["ew2"].shape[1]

    # fuse mu/logvar heads into one [h2, 2L] weight / [1, 2L] bias
    mvw = jnp.concatenate([params["mw"], params["vw"]], axis=1)
    mvb = jnp.concatenate([params["mb"], params["vb"]], axis=1)

    # ---- batch tiling ----
    # Size the tile from B (avoid up-to-2x pad waste of a hard 512/2048 tile),
    # cap at ~2048 rows, and force an even >=2 step count when B > 8 so the
    # "parallel" batch axis shards across both TensorCores on v7x.
    MAX_TB = 2048
    if B <= 8:
        n_steps = 1
    else:
        n_steps = max(2, pl.cdiv(B, MAX_TB))
        n_steps += n_steps % 2          # even number of steps -> balanced TCs
    block_b = _round_up(pl.cdiv(B, n_steps), 8)
    B_pad = n_steps * block_b

    out_w = D + 2 * L
    out_pad = _round_up(out_w, 128)      # lane-dense output width
    pad_cols = out_pad - out_w

    # bf16 for all HBM traffic; compute stays f32 inside the kernel.
    bf16 = jnp.bfloat16
    x_in = x.astype(bf16)
    eps_in = eps.astype(bf16)
    if B_pad != B:
        x_in = jnp.pad(x_in, ((0, B_pad - B), (0, 0)))
        eps_in = jnp.pad(eps_in, ((0, B_pad - B), (0, 0)))

    mm_weights = (
        params["ew1"], params["ew2"], mvw,
        params["dw1"], params["dw2"], params["dw3"],
    )
    mm_weights_bf16 = tuple(w.astype(bf16) for w in mm_weights)

    # Pack the ten tiny [1,N] bias / LN-param vectors into one f32 slab
    # [10, max_width] -> a single DMA stream / single VMEM tile.
    bias_list = [
        params["eb1"], params["eb2"], params["g1"], params["bb1"], mvb,
        params["db1"], params["db2"], params["g2"], params["bb2"], params["db3"],
    ]
    max_w = max(bv.shape[1] for bv in bias_list)
    bias_slab = jnp.stack(
        [jnp.pad(bv[0].astype(jnp.float32), (0, max_w - bv.shape[1]))
         for bv in bias_list]
    )

    batch_spec = lambda w: pl.BlockSpec((block_b, w), lambda i: (i, 0))
    const_spec = lambda arr: pl.BlockSpec(arr.shape, lambda i: (0, 0))

    kernel = functools.partial(vae_kernel, pad_cols=pad_cols)

    # advisory cost estimate for XLA scheduling around the custom call
    flops_per_row = 2 * (D * H + H * h2 + h2 * 2 * L + L * h2 + h2 * H + H * D)
    weight_bytes = sum(int(w.size) for w in mm_weights_bf16) * 2 \
        + int(bias_slab.size) * 4
    cost = pl.CostEstimate(
        flops=B_pad * flops_per_row,
        transcendentals=B_pad * (D + L + 2),
        bytes_accessed=B_pad * (D + L + out_pad) * 2 + weight_bytes,
    )

    out = pl.pallas_call(
        kernel,
        grid=(n_steps,),
        in_specs=[batch_spec(D), batch_spec(L)]
                 + [const_spec(w) for w in mm_weights_bf16]
                 + [const_spec(bias_slab)],
        out_specs=pl.BlockSpec((block_b, out_pad), lambda i: (i, 0)),
        out_shape=jax.ShapeDtypeStruct((B_pad, out_pad), bf16),
        compiler_params=pltpu.CompilerParams(
            dimension_semantics=("parallel",),
            # Tiles are small (few MiB even at TB=2048), but v5e's scoped
            # default is only 16 MiB -> set an explicit, comfortable limit.
            vmem_limit_bytes=32 * 1024 * 1024,
        ),
        cost_estimate=cost,
    )(x_in, eps_in, *mm_weights_bf16, bias_slab)

    out = out.astype(jnp.float32)
    recon = out[:B, :D]
    mu = out[:B, D:D + L]
    logvar = out[:B, D + L:D + 2 * L]
    return recon, mu, logvar


vae_forward_jit = jax.jit(vae_forward)


def init_params(key, input_dim, hidden_dim, latent_dim):
    """Deterministic kaiming-normal-ish init (fan_in, leaky_relu gain)."""
    h2 = hidden_dim // 2

    def linear(key, fan_in, fan_out):
        gain = jnp.sqrt(2.0)
        std = gain / jnp.sqrt(fan_in)
        w = jax.random.normal(key, (fan_in, fan_out), jnp.float32) * std
        b = jnp.zeros((1, fan_out), jnp.float32)
        return w, b

    keys = jax.random.split(key, 6)
    ew1, eb1 = linear(keys[0], input_dim, hidden_dim)
    ew2, eb2 = linear(keys[1], hidden_dim, h2)
    mw, mb = linear(keys[2], h2, latent_dim)
    vw, vb = linear(keys[3], h2, latent_dim)
    dw1, db1 = linear(keys[4], latent_dim, h2)
    dw2, db2 = linear(keys[5], h2, hidden_dim)
    dw3, db3 = linear(jax.random.fold_in(key, 7), hidden_dim, input_dim)

    return dict(
        ew1=ew1, eb1=eb1, ew2=ew2, eb2=eb2,
        g1=jnp.ones((1, h2), jnp.float32), bb1=jnp.zeros((1, h2), jnp.float32),
        mw=mw, mb=mb, vw=vw, vb=vb,
        dw1=dw1, db1=db1, dw2=dw2, db2=db2,
        g2=jnp.ones((1, hidden_dim), jnp.float32),
        bb2=jnp.zeros((1, hidden_dim), jnp.float32),
        dw3=dw3, db3=db3,
    )


def vae_forward_ref(x, eps, p):
    """Pure-JAX f32 reference for correctness checking."""
    h = _leaky_relu(x @ p["ew1"] + p["eb1"])
    h = _leaky_relu(_layernorm(h @ p["ew2"] + p["eb2"], p["g1"], p["bb1"]))
    mu = h @ p["mw"] + p["mb"]
    logvar = h @ p["vw"] + p["vb"]
    z = mu + eps * jnp.exp(0.5 * logvar)
    d = _leaky_relu(z @ p["dw1"] + p["db1"])
    d = _leaky_relu(_layernorm(d @ p["dw2"] + p["db2"], p["g2"], p["bb2"]))
    recon = jax.nn.sigmoid(d @ p["dw3"] + p["db3"])
    return recon, mu, logvar


if __name__ == "__main__":
    # small shapes consistent with the module: x is [batch, input_dim]
    B, INPUT_DIM, HIDDEN_DIM, LATENT_DIM = 8, 64, 32, 16

    key = jax.random.PRNGKey(0)
    k_x, k_eps, k_p = jax.random.split(key, 3)

    x = jax.random.uniform(k_x, (B, INPUT_DIM), jnp.float32)
    eps = jax.random.normal(k_eps, (B, LATENT_DIM), jnp.float32)
    params = init_params(k_p, INPUT_DIM, HIDDEN_DIM, LATENT_DIM)

    recon, mu, logvar = vae_forward_jit(x, eps, params)
    jax.block_until_ready((recon, mu, logvar))

    # sanity check against pure-JAX f32 reference
    # (tolerances loosened because HBM I/O is bf16; compute is f32)
    recon_r, mu_r, logvar_r = vae_forward_ref(x, eps, params)
    assert jnp.allclose(recon, recon_r, atol=5e-2, rtol=5e-2)
    assert jnp.allclose(mu, mu_r, atol=5e-2, rtol=5e-2)
    assert jnp.allclose(logvar, logvar_r, atol=5e-2, rtol=5e-2)

    print("KERNEL_OK")
</pallas_src>

<mosaic_0001>
module attributes {stable_mosaic.version = 11 : i64} {
  func.func @vae_kernel(%arg0: i32, %arg1: memref<8x64xbf16, #tpu.memory_space<vmem>>, %arg2: memref<8x16xbf16, #tpu.memory_space<vmem>>, %arg3: memref<64x32xbf16, #tpu.memory_space<vmem>>, %arg4: memref<32x16xbf16, #tpu.memory_space<vmem>>, %arg5: memref<16x32xbf16, #tpu.memory_space<vmem>>, %arg6: memref<16x16xbf16, #tpu.memory_space<vmem>>, %arg7: memref<16x32xbf16, #tpu.memory_space<vmem>>, %arg8: memref<32x64xbf16, #tpu.memory_space<vmem>>, %arg9: memref<10x64xf32, #tpu.memory_space<vmem>>, %arg10: memref<8x128xbf16, #tpu.memory_space<vmem>>) attributes {dimension_semantics = [#tpu.dimension_semantics<parallel>], iteration_bounds = array<i64: 1>, scalar_prefetch = 0 : i64, scratch_operands = 0 : i64, tpu.core_type = #tpu.core_type<tc>, window_params = [{transform_indices = @transform_0, window_bounds = array<i64: 8, 64>}, {transform_indices = @transform_1, window_bounds = array<i64: 8, 16>}, {pipeline_mode = #tpu.pipeline_mode<synchronous>, transform_indices = @transform_2, window_bounds = array<i64: 64, 32>}, {pipeline_mode = #tpu.pipeline_mode<synchronous>, transform_indices = @transform_3, window_bounds = array<i64: 32, 16>}, {pipeline_mode = #tpu.pipeline_mode<synchronous>, transform_indices = @transform_4, window_bounds = array<i64: 16, 32>}, {pipeline_mode = #tpu.pipeline_mode<synchronous>, transform_indices = @transform_5, window_bounds = array<i64: 16, 16>}, {pipeline_mode = #tpu.pipeline_mode<synchronous>, transform_indices = @transform_6, window_bounds = array<i64: 16, 32>}, {pipeline_mode = #tpu.pipeline_mode<synchronous>, transform_indices = @transform_7, window_bounds = array<i64: 32, 64>}, {pipeline_mode = #tpu.pipeline_mode<synchronous>, transform_indices = @transform_8, window_bounds = array<i64: 10, 64>}, {transform_indices = @transform_9, window_bounds = array<i64: 8, 128>}]} {
    %c0 = arith.constant 0 : index
    %c0_0 = arith.constant 0 : index
    %0 = vector.load %arg1[%c0, %c0_0] : memref<8x64xbf16, #tpu.memory_space<vmem>>, vector<8x64xbf16>
    %1 = arith.extf %0 : vector<8x64xbf16> to vector<8x64xf32>
    %c0_1 = arith.constant 0 : index
    %c0_2 = arith.constant 0 : index
    %2 = vector.load %arg2[%c0_1, %c0_2] : memref<8x16xbf16, #tpu.memory_space<vmem>>, vector<8x16xbf16>
    %3 = arith.extf %2 : vector<8x16xbf16> to vector<8x16xf32>
    %c0_3 = arith.constant 0 : index
    %c0_4 = arith.constant 0 : index
    %4 = vector.load %arg3[%c0_3, %c0_4] : memref<64x32xbf16, #tpu.memory_space<vmem>>, vector<64x32xbf16>
    %5 = arith.extf %4 : vector<64x32xbf16> to vector<64x32xf32>
    %c0_5 = arith.constant 0 : index
    %c0_6 = arith.constant 0 : index
    %6 = vector.load %arg4[%c0_5, %c0_6] : memref<32x16xbf16, #tpu.memory_space<vmem>>, vector<32x16xbf16>
    %7 = arith.extf %6 : vector<32x16xbf16> to vector<32x16xf32>
    %c0_7 = arith.constant 0 : index
    %c0_8 = arith.constant 0 : index
    %8 = vector.load %arg5[%c0_7, %c0_8] : memref<16x32xbf16, #tpu.memory_space<vmem>>, vector<16x32xbf16>
    %9 = arith.extf %8 : vector<16x32xbf16> to vector<16x32xf32>
    %c0_9 = arith.constant 0 : index
    %c0_10 = arith.constant 0 : index
    %10 = vector.load %arg6[%c0_9, %c0_10] : memref<16x16xbf16, #tpu.memory_space<vmem>>, vector<16x16xbf16>
    %11 = arith.extf %10 : vector<16x16xbf16> to vector<16x16xf32>
    %c0_11 = arith.constant 0 : index
    %c0_12 = arith.constant 0 : index
    %12 = vector.load %arg7[%c0_11, %c0_12] : memref<16x32xbf16, #tpu.memory_space<vmem>>, vector<16x32xbf16>
    %13 = arith.extf %12 : vector<16x32xbf16> to vector<16x32xf32>
    %c0_13 = arith.constant 0 : index
    %c0_14 = arith.constant 0 : index
    %14 = vector.load %arg8[%c0_13, %c0_14] : memref<32x64xbf16, #tpu.memory_space<vmem>>, vector<32x64xbf16>
    %15 = arith.extf %14 : vector<32x64xbf16> to vector<32x64xf32>
    %c0_15 = arith.constant 0 : index
    %c0_16 = arith.constant 0 : index
    %16 = vector.load %arg9[%c0_15, %c0_16] : memref<10x64xf32, #tpu.memory_space<vmem>>, vector<10x64xf32>
    %17 = vector.extract_strided_slice %16 {offsets = [0, 0], sizes = [1, 32], strides = [1, 1]} : vector<10x64xf32> to vector<1x32xf32>
    %18 = vector.extract_strided_slice %16 {offsets = [1, 0], sizes = [1, 16], strides = [1, 1]} : vector<10x64xf32> to vector<1x16xf32>
    %19 = vector.extract_strided_slice %16 {offsets = [2, 0], sizes = [1, 16], strides = [1, 1]} : vector<10x64xf32> to vector<1x16xf32>
    %20 = vector.extract_strided_slice %16 {offsets = [3, 0], sizes = [1, 16], strides = [1, 1]} : vector<10x64xf32> to vector<1x16xf32>
    %21 = vector.extract_strided_slice %16 {offsets = [4, 0], sizes = [1, 32], strides = [1, 1]} : vector<10x64xf32> to vector<1x32xf32>
    %22 = vector.extract_strided_slice %16 {offsets = [5, 0], sizes = [1, 16], strides = [1, 1]} : vector<10x64xf32> to vector<1x16xf32>
    %23 = vector.extract_strided_slice %16 {offsets = [6, 0], sizes = [1, 32], strides = [1, 1]} : vector<10x64xf32> to vector<1x32xf32>
    %24 = vector.extract_strided_slice %16 {offsets = [7, 0], sizes = [1, 32], strides = [1, 1]} : vector<10x64xf32> to vector<1x32xf32>
    %25 = vector.extract_strided_slice %16 {offsets = [8, 0], sizes = [1, 32], strides = [1, 1]} : vector<10x64xf32> to vector<1x32xf32>
    %26 = vector.extract_strided_slice %16 {offsets = [9, 0], sizes = [1, 64], strides = [1, 1]} : vector<10x64xf32> to vector<1x64xf32>
    %cst = arith.constant dense<0.000000e+00> : vector<8x32xf32>
    %27 = tpu.matmul %1, %5, %cst {dimension_numbers = #tpu.dot_dimension_numbers<[1], [0], [0], [1], [0, 0, 1, 1], [], []>} : vector<8x64xf32>, vector<64x32xf32>, vector<8x32xf32> -> vector<8x32xf32>
    %28 = vector.broadcast %17 : vector<1x32xf32> to vector<8x32xf32>
    %29 = arith.addf %27, %28 : vector<8x32xf32>
    %cst_17 = arith.constant 0.000000e+00 : f32
    %30 = vector.broadcast %cst_17 : f32 to vector<8x32xf32>
    %31 = arith.cmpf ogt, %29, %30 : vector<8x32xf32>
    %cst_18 = arith.constant 2.000000e-01 : f32
    %32 = vector.broadcast %cst_18 : f32 to vector<8x32xf32>
    %33 = arith.mulf %32, %29 : vector<8x32xf32>
    %34 = arith.select %31, %29, %33 : vector<8x32xi1>, vector<8x32xf32>
    %cst_19 = arith.constant dense<0.000000e+00> : vector<8x16xf32>
    %35 = tpu.matmul %34, %7, %cst_19 {dimension_numbers = #tpu.dot_dimension_numbers<[1], [0], [0], [1], [0, 0, 1, 1], [], []>} : vector<8x32xf32>, vector<32x16xf32>, vector<8x16xf32> -> vector<8x16xf32>
    %36 = vector.broadcast %18 : vector<1x16xf32> to vector<8x16xf32>
    %37 = arith.addf %35, %36 : vector<8x16xf32>
    %cst_20 = arith.constant dense<0.000000e+00> : vector<8xf32>
    %38 = vector.multi_reduction <add>, %37, %cst_20 [1] : vector<8x16xf32> to vector<8xf32>
    %39 = vector.shape_cast %38 : vector<8xf32> to vector<8x1xf32>
    %cst_21 = arith.constant 1.600000e+01 : f32
    %40 = vector.broadcast %cst_21 : f32 to vector<8x1xf32>
    %41 = arith.divf %39, %40 : vector<8x1xf32>
    %42 = arith.mulf %37, %37 : vector<8x16xf32>
    %cst_22 = arith.constant dense<0.000000e+00> : vector<8xf32>
    %43 = vector.multi_reduction <add>, %42, %cst_22 [1] : vector<8x16xf32> to vector<8xf32>
    %44 = vector.shape_cast %43 : vector<8xf32> to vector<8x1xf32>
    %cst_23 = arith.constant 1.600000e+01 : f32
    %45 = vector.broadcast %cst_23 : f32 to vector<8x1xf32>
    %46 = arith.divf %44, %45 : vector<8x1xf32>
    %47 = arith.mulf %41, %41 : vector<8x1xf32>
    %48 = arith.subf %46, %47 : vector<8x1xf32>
    %49 = vector.broadcast %41 : vector<8x1xf32> to vector<8x16xf32>
    %50 = arith.subf %37, %49 : vector<8x16xf32>
    %cst_24 = arith.constant 9.99999974E-6 : f32
    %51 = vector.broadcast %cst_24 : f32 to vector<8x1xf32>
    %52 = arith.addf %48, %51 : vector<8x1xf32>
    %53 = math.rsqrt %52 : vector<8x1xf32>
    %54 = vector.broadcast %53 : vector<8x1xf32> to vector<8x16xf32>
    %55 = arith.mulf %50, %54 : vector<8x16xf32>
    %56 = vector.broadcast %19 : vector<1x16xf32> to vector<8x16xf32>
    %57 = arith.mulf %55, %56 : vector<8x16xf32>
    %58 = vector.broadcast %20 : vector<1x16xf32> to vector<8x16xf32>
    %59 = arith.addf %57, %58 : vector<8x16xf32>
    %cst_25 = arith.constant 0.000000e+00 : f32
    %60 = vector.broadcast %cst_25 : f32 to vector<8x16xf32>
    %61 = arith.cmpf ogt, %59, %60 : vector<8x16xf32>
    %cst_26 = arith.constant 2.000000e-01 : f32
    %62 = vector.broadcast %cst_26 : f32 to vector<8x16xf32>
    %63 = arith.mulf %62, %59 : vector<8x16xf32>
    %64 = arith.select %61, %59, %63 : vector<8x16xi1>, vector<8x16xf32>
    %cst_27 = arith.constant dense<0.000000e+00> : vector<8x32xf32>
    %65 = tpu.matmul %64, %9, %cst_27 {dimension_numbers = #tpu.dot_dimension_numbers<[1], [0], [0], [1], [0, 0, 1, 1], [], []>} : vector<8x16xf32>, vector<16x32xf32>, vector<8x32xf32> -> vector<8x32xf32>
    %66 = vector.broadcast %21 : vector<1x32xf32> to vector<8x32xf32>
    %67 = arith.addf %65, %66 : vector<8x32xf32>
    %68 = vector.extract_strided_slice %67 {offsets = [0, 0], sizes = [8, 16], strides = [1, 1]} : vector<8x32xf32> to vector<8x16xf32>
    %69 = vector.extract_strided_slice %67 {offsets = [0, 16], sizes = [8, 16], strides = [1, 1]} : vector<8x32xf32> to vector<8x16xf32>
    %cst_28 = arith.constant 5.000000e-01 : f32
    %70 = vector.broadcast %cst_28 : f32 to vector<8x16xf32>
    %71 = arith.mulf %70, %69 : vector<8x16xf32>
    %72 = math.exp %71 : vector<8x16xf32>
    %73 = arith.mulf %3, %72 : vector<8x16xf32>
    %74 = arith.addf %68, %73 : vector<8x16xf32>
    %cst_29 = arith.constant dense<0.000000e+00> : vector<8x16xf32>
    %75 = tpu.matmul %74, %11, %cst_29 {dimension_numbers = #tpu.dot_dimension_numbers<[1], [0], [0], [1], [0, 0, 1, 1], [], []>} : vector<8x16xf32>, vector<16x16xf32>, vector<8x16xf32> -> vector<8x16xf32>
    %76 = vector.broadcast %22 : vector<1x16xf32> to vector<8x16xf32>
    %77 = arith.addf %75, %76 : vector<8x16xf32>
    %cst_30 = arith.constant 0.000000e+00 : f32
    %78 = vector.broadcast %cst_30 : f32 to vector<8x16xf32>
    %79 = arith.cmpf ogt, %77, %78 : vector<8x16xf32>
    %cst_31 = arith.constant 2.000000e-01 : f32
    %80 = vector.broadcast %cst_31 : f32 to vector<8x16xf32>
    %81 = arith.mulf %80, %77 : vector<8x16xf32>
    %82 = arith.select %79, %77, %81 : vector<8x16xi1>, vector<8x16xf32>
    %cst_32 = arith.constant dense<0.000000e+00> : vector<8x32xf32>
    %83 = tpu.matmul %82, %13, %cst_32 {dimension_numbers = #tpu.dot_dimension_numbers<[1], [0], [0], [1], [0, 0, 1, 1], [], []>} : vector<8x16xf32>, vector<16x32xf32>, vector<8x32xf32> -> vector<8x32xf32>
    %84 = vector.broadcast %23 : vector<1x32xf32> to vector<8x32xf32>
    %85 = arith.addf %83, %84 : vector<8x32xf32>
    %cst_33 = arith.constant dense<0.000000e+00> : vector<8xf32>
    %86 = vector.multi_reduction <add>, %85, %cst_33 [1] : vector<8x32xf32> to vector<8xf32>
    %87 = vector.shape_cast %86 : vector<8xf32> to vector<8x1xf32>
    %cst_34 = arith.constant 3.200000e+01 : f32
    %88 = vector.broadcast %cst_34 : f32 to vector<8x1xf32>
    %89 = arith.divf %87, %88 : vector<8x1xf32>
    %90 = arith.mulf %85, %85 : vector<8x32xf32>
    %cst_35 = arith.constant dense<0.000000e+00> : vector<8xf32>
    %91 = vector.multi_reduction <add>, %90, %cst_35 [1] : vector<8x32xf32> to vector<8xf32>
    %92 = vector.shape_cast %91 : vector<8xf32> to vector<8x1xf32>
    %cst_36 = arith.constant 3.200000e+01 : f32
    %93 = vector.broadcast %cst_36 : f32 to vector<8x1xf32>
    %94 = arith.divf %92, %93 : vector<8x1xf32>
    %95 = arith.mulf %89, %89 : vector<8x1xf32>
    %96 = arith.subf %94, %95 : vector<8x1xf32>
    %97 = vector.broadcast %89 : vector<8x1xf32> to vector<8x32xf32>
    %98 = arith.subf %85, %97 : vector<8x32xf32>
    %cst_37 = arith.constant 9.99999974E-6 : f32
    %99 = vector.broadcast %cst_37 : f32 to vector<8x1xf32>
    %100 = arith.addf %96, %99 : vector<8x1xf32>
    %101 = math.rsqrt %100 : vector<8x1xf32>
    %102 = vector.broadcast %101 : vector<8x1xf32> to vector<8x32xf32>
    %103 = arith.mulf %98, %102 : vector<8x32xf32>
    %104 = vector.broadcast %24 : vector<1x32xf32> to vector<8x32xf32>
    %105 = arith.mulf %103, %104 : vector<8x32xf32>
    %106 = vector.broadcast %25 : vector<1x32xf32> to vector<8x32xf32>
    %107 = arith.addf %105, %106 : vector<8x32xf32>
    %cst_38 = arith.constant 0.000000e+00 : f32
    %108 = vector.broadcast %cst_38 : f32 to vector<8x32xf32>
    %109 = arith.cmpf ogt, %107, %108 : vector<8x32xf32>
    %cst_39 = arith.constant 2.000000e-01 : f32
    %110 = vector.broadcast %cst_39 : f32 to vector<8x32xf32>
    %111 = arith.mulf %110, %107 : vector<8x32xf32>
    %112 = arith.select %109, %107, %111 : vector<8x32xi1>, vector<8x32xf32>
    %cst_40 = arith.constant dense<0.000000e+00> : vector<8x64xf32>
    %113 = tpu.matmul %112, %15, %cst_40 {dimension_numbers = #tpu.dot_dimension_numbers<[1], [0], [0], [1], [0, 0, 1, 1], [], []>} : vector<8x32xf32>, vector<32x64xf32>, vector<8x64xf32> -> vector<8x64xf32>
    %114 = vector.broadcast %26 : vector<1x64xf32> to vector<8x64xf32>
    %115 = arith.addf %113, %114 : vector<8x64xf32>
    %116 = arith.negf %115 : vector<8x64xf32>
    %117 = math.exp %116 : vector<8x64xf32>
    %cst_41 = arith.constant 1.000000e+00 : f32
    %118 = vector.broadcast %cst_41 : f32 to vector<8x64xf32>
    %119 = arith.addf %118, %117 : vector<8x64xf32>
    %120 = arith.divf %118, %119 : vector<8x64xf32>
    %cst_42 = arith.constant 0.000000e+00 : f32
    %121 = vector.broadcast %cst_42 : f32 to vector<8x32xf32>
    %122 = tpu.concatenate %120, %67, %121 in 1 : vector<8x64xf32>, vector<8x32xf32>, vector<8x32xf32> -> vector<8x128xf32>
    %123 = arith.truncf %122 : vector<8x128xf32> to vector<8x128xbf16>
    %c0_43 = arith.constant 0 : index
    %c0_44 = arith.constant 0 : index
    %124 = vector.load %arg10[%c0_43, %c0_44] : memref<8x128xbf16, #tpu.memory_space<vmem>>, vector<8x128xbf16>
    tpu.vector_store %arg10[%c0_43, %c0_44], %123 {strides = array<i32>} : memref<8x128xbf16, #tpu.memory_space<vmem>>, vector<8x128xbf16>,
    return
  }
  func.func @transform_0(%arg0: i32) -> (i32, i32) {
    %c0_i32 = arith.constant 0 : i32
    %c0_i32_0 = arith.constant 0 : i32
    return %arg0, %c0_i32 : i32, i32
  }
  func.func @transform_1(%arg0: i32) -> (i32, i32) {
    %c0_i32 = arith.constant 0 : i32
    %c0_i32_0 = arith.constant 0 : i32
    return %arg0, %c0_i32 : i32, i32
  }
  func.func @transform_2(%arg0: i32) -> (i32, i32) {
    %c0_i32 = arith.constant 0 : i32
    %c0_i32_0 = arith.constant 0 : i32
    %c0_i32_1 = arith.constant 0 : i32
    return %c0_i32, %c0_i32_0 : i32, i32
  }
  func.func @transform_3(%arg0: i32) -> (i32, i32) {
    %c0_i32 = arith.constant 0 : i32
    %c0_i32_0 = arith.constant 0 : i32
    %c0_i32_1 = arith.constant 0 : i32
    return %c0_i32, %c0_i32_0 : i32, i32
  }
  func.func @transform_4(%arg0: i32) -> (i32, i32) {
    %c0_i32 = arith.constant 0 : i32
    %c0_i32_0 = arith.constant 0 : i32
    %c0_i32_1 = arith.constant 0 : i32
    return %c0_i32, %c0_i32_0 : i32, i32
  }
  func.func @transform_5(%arg0: i32) -> (i32, i32) {
    %c0_i32 = arith.constant 0 : i32
    %c0_i32_0 = arith.constant 0 : i32
    %c0_i32_1 = arith.constant 0 : i32
    return %c0_i32, %c0_i32_0 : i32, i32
  }
  func.func @transform_6(%arg0: i32) -> (i32, i32) {
    %c0_i32 = arith.constant 0 : i32
    %c0_i32_0 = arith.constant 0 : i32
    %c0_i32_1 = arith.constant 0 : i32
    return %c0_i32, %c0_i32_0 : i32, i32
  }
  func.func @transform_7(%arg0: i32) -> (i32, i32) {
    %c0_i32 = arith.constant 0 : i32
    %c0_i32_0 = arith.constant 0 : i32
    %c0_i32_1 = arith.constant 0 : i32
    return %c0_i32, %c0_i32_0 : i32, i32
  }
  func.func @transform_8(%arg0: i32) -> (i32, i32) {
    %c0_i32 = arith.constant 0 : i32
    %c0_i32_0 = arith.constant 0 : i32
    %c0_i32_1 = arith.constant 0 : i32
    return %c0_i32, %c0_i32_0 : i32, i32
  }
  func.func @transform_9(%arg0: i32) -> (i32, i32) {
    %c0_i32 = arith.constant 0 : i32
    %c0_i32_0 = arith.constant 0 : i32
    return %arg0, %c0_i32 : i32, i32
  }
}

</mosaic_0001>

<bundles_post_ra>
// kernel: vae_forward.1
= control target key start
LH: loop header
LB: loop body
LE: loop exit
PB: predicated region body
PF: predicated region fallthrough
CT: control target
= control target key end

     0   :  { %vm83_vm0 = vcmask 523264   ;;  %vm111_vm2 = vcmask 261120   ;;  %vm135_vm3 = vcmask 130048   ;;  %v426_v32 = vmov 16.0   ;;  %s549_s2 = inlined_call_operand.vmem [shape: bf16[64,32], index: 2, kind: input, shape index: {}]   ;;  %s550_s3 = inlined_call_operand.vmem [shape: bf16[32,16], index: 3, kind: input, shape index: {}]   ;;  %s551_s0 = inlined_call_operand.vmem [shape: bf16[8,64], index: 0, kind: input, shape index: {}]   ;;  %s552_s8 = inlined_call_operand.vmem [shape: f32[10,64], index: 8, kind: input, shape index: {}]   ;;  %s553_s4 = inlined_call_operand.vmem [shape: bf16[16,32], index: 4, kind: input, shape index: {}]   ;;  %s554_s5 = inlined_call_operand.vmem [shape: bf16[16,16], index: 5, kind: input, shape index: {}]   ;;  %s555_s6 = inlined_call_operand.vmem [shape: bf16[16,32], index: 6, kind: input, shape index: {}]   ;;  %s556_s1 = inlined_call_operand.vmem [shape: bf16[8,16], index: 1, kind: input, shape index: {}]   ;;  %s557_s7 = inlined_call_operand.vmem [shape: bf16[32,64], index: 7, kind: input, shape index: {}]   ;;  %s558_s9 = inlined_call_operand.vmem [shape: bf16[8,128], index: 9, kind: output, shape index: {}]  }
   0x1   :  { %v405_v0 = vld [vmem:[%s549_s2 + $0x18] sm:$0xff]   ;;  %v404_v1 = vld [vmem:[%s549_s2 + $0x10] sm:$0xff]   ;;  %v406_v4 = vld [vmem:[%s550_s3 + $0x8] sm:$0xff]   ;;  %412 = vrcp.f32 %v426_v32 }
   0x2   :  { %v374_v2 = vunpack.c.h.bf16 %v405_v0  ;;  %v373_v3 = vunpack.c.l.bf16 %v405_v0  ;;  %v370_v5 = vunpack.c.h.bf16 %v404_v1  ;;  %v382_v6 = vunpack.c.h.bf16 %v406_v4  ;;  %v403_v7 = vld [vmem:[%s549_s2 + $0x8] sm:$0xff]   ;;  %v360_v10 = vld [vmem:[%s549_s2] sm:$0xff]  }
   0x3   :  { %v369_v8 = vunpack.c.l.bf16 %v404_v1  ;;  %v366_v9 = vunpack.c.h.bf16 %v403_v7  ;;  %v365_v11 = vunpack.c.l.bf16 %v403_v7  ;;  %v362_v12 = vunpack.c.h.bf16 %v360_v10  ;;  %v32_v13 = vld [vmem:[%s551_s0] sm:$0xf] }
   0x4   :  { %95 = vmatpush.msra.mxu0 %v374_v2  ;;  %127 = vmatpush.msra.mxu1 %v382_v6  ;;  %v361_v14 = vunpack.c.l.bf16 %v360_v10  ;;  %v33_v15 = vunpack.c.l.bf16 %v32_v13  ;;  %v381_v16 = vunpack.c.l.bf16 %v406_v4  ;;  %v376_v17 = vld [vmem:[%s550_s3] sm:$0xff]  }
   0x5   :  { %v378_v18 = vunpack.c.h.bf16 %v376_v17  ;;  %v377_v19 = vunpack.c.l.bf16 %v376_v17  ;;  %v505_v20 = vld [vmem:[%s552_s8] sm:$0xff] }
   0x6   :  { %96 = vmatpush.msra.mxu0 %v373_v3  ;;  %128 = vmatpush.msra.mxu1 %v381_v16  ;;  %v82_v21 = vperm.slane %v505_v20, 0  ;;  %v110_v26 = vperm.slane %v505_v20, 1  ;;  %v384_v39 = vld [vmem:[%s553_s4] sm:$0xff]   ;;  %v167_v56 = vperm.slane %v505_v20, 2  ;;  %v169_v59 = vperm.slane %v505_v20, 3  ;;  %s427_s4 = smov 112  }
   0x7   :  { %v413_v33 = vpop.eup %412  ;;  %v386_v40 = vunpack.c.h.bf16 %v384_v39  ;;  %v385_v41 = vunpack.c.l.bf16 %v384_v39  ;;  %v174_v0 = vperm.slane %v505_v20, 4  ;;  %v388_v6 = vld [vmem:[%s554_s5] sm:$0xff]   ;;  %v207_v17 = vperm.slane %v505_v20, 5 }
   0x8   :  { %97 = vmatpush.msra.mxu0 %v370_v5  ;;  %129 = vmatpush.msra.mxu1 %v378_v18  ;;  %v140_v34 = vmul.f32 16.0, %v413_v33  ;;  %vm144_vm4 = vweird.f32 %v413_v33  ;;  %v390_v7 = vunpack.c.h.bf16 %v388_v6 }
   0x9   :  { %192 = vmatpush.msra.mxu2 %v386_v40 }
   0xa   :  { %98 = vmatpush.msra.mxu0 %v369_v8  ;;  %130 = vmatpush.msra.mxu1 %v377_v19  ;;  %v141_v35 = vsub.f32 1.0, %v140_v34  ;;  %v389_v8 = vunpack.c.l.bf16 %v388_v6 }
   0xb   :  { %193 = vmatpush.msra.mxu2 %v385_v41  ;;  %225 = vmatpush.msra.mxu3 %v390_v7 }
   0xc   :  { %99 = vmatpush.msra.mxu0 %v366_v9  ;;  %v142_v36 = vmul.f32 %v413_v33, %v141_v35  ;;  %v392_v9 = vld [vmem:[%s555_s6] sm:$0xff]   ;;  %v407_v35 = vld [vmem:[%s557_s7 + $0x8] sm:$0xff]  }
   0xd   :  { %226 = vmatpush.msra.mxu3 %v389_v8  ;;  %v394_v10 = vunpack.c.h.bf16 %v392_v9  ;;  %v393_v16 = vunpack.c.l.bf16 %v392_v9 }
   0xe   :  { %100 = vmatpush.msra.mxu0 %v365_v11  ;;  %v143_v37 = vadd.f32 %v413_v33, %v142_v36  ;;  %v34_v11 = vld [vmem:[%s556_s1] sm:$0xf]  ;;  %s428_s1 = smov 64   ;;  %v402_v36 = vunpack.c.h.bf16 %v407_v35 }
   0xf   :  { %252 = vmatpush.msrb.mxu2 %v394_v10 }
  0x10   :  { %101 = vmatpush.msra.mxu0 %v362_v12  ;;  %v145_v42 = vsel %vm144_vm4, %v413_v33, %v143_v37  ;;  %v35_v12 = vunpack.c.l.bf16 %v34_v11  ;;  %v401_v37 = vunpack.c.l.bf16 %v407_v35  ;;  %312 = vmatpush.msrb.mxu3 %v402_v36  ;;  %vm344_vm4 = vcmask 785408  }
  0x11   :  { %253 = vmatpush.msrb.mxu2 %v393_v16 }
  0x12   :  { %102 = vmatpush.msra.mxu0 %v361_v14  ;;  %313 = vmatpush.msrb.mxu3 %v401_v37 }
  0x13   :  { %352 = vmatmul.msk.f32.vlgmr.msra.gmra.mxu0 %vm83_vm0, %v33_v15 }
  0x90   :  { %v104_v22 = vpop.f32.mrf.mxu0 }
  0x91   :  { %v105_v23 = vadd.f32 %v104_v22, %v82_v21 }
  0x93   :  { %v108_v24 = vmul.f32 0.2, %v105_v23  ;;  %vm107_vm1 = vcmp.gt.f32.partialorder %v105_v23, 0.0 }
  0x95   :  { %v109_v25 = vsel %vm107_vm1, %v105_v23, %v108_v24  ;;  %v234_v23 = vperm.slane %v505_v20, 6 }
  0x96   :  { %353 = vmatmul.msk.f32.vlgmr.msra.gmra.mxu1 %vm111_vm2, %v109_v25 }
 0x113   :  { %v132_v27 = vpop.f32.mrf.mxu1 }
 0x114   :  { %v133_v28 = vadd.f32 %v132_v27, %v110_v26 }
 0x116   :  { %v136_v29 = vsel %vm135_vm3, %v133_v28, 0.0  ;;  %v147_v30 = vmul.f32 %v133_v28, %v133_v28 }
 0x117   :  { %137 = vadd.xlane.f32.xlu0 %v136_v29  ;;  %v429_v29 = vmov 32.0  }
 0x118   :  { %v148_v31 = vsel %vm135_vm3, %v147_v30, 0.0 }
 0x11f   :  { %149 = vadd.xlane.f32.xlu0 %v148_v31 }
 0x18a   :  { %v138_v38 = vpop.xlane.xlu0 %137 }
 0x18b   :  { %v146_v43 = vmul.f32 %v145_v42, %v138_v38  ;;  %v396_v38 = vld [vmem:[%s557_s7] sm:$0xff]  }
 0x18c   :  { %v398_v39 = vunpack.c.h.bf16 %v396_v38  ;;  %v397_v41 = vunpack.c.l.bf16 %v396_v38 }
 0x18d   :  { %v152_v45 = vmul.f32 %v146_v43, %v146_v43  ;;  %v154_v55 = vsub.f32 %v133_v28, %v146_v43 }
 0x18e   :  { %314 = vmatpush.msrb.mxu3 %v398_v39 }
 0x190   :  { %315 = vmatpush.msrb.mxu3 %v397_v41 }
 0x192   :  { %v150_v44 = vpop.xlane.xlu0 %149 }
 0x193   :  { %v151_v46 = vmul.f32 %v150_v44, %v145_v42 }
 0x195   :  { %v153_v47 = vsub.f32 %v151_v46, %v152_v45 }
 0x197   :  { %v155_v48 = vadd.f32 1e-05, %v153_v47 }
 0x199   :  { %414 = vrsqrt.f32 %v155_v48  ;;  %vm162_vm6 = vweird.f32 %v155_v48 }
 0x19f   :  { %v415_v49 = vpop.eup %414 }
 0x1a0   :  { %v157_v50 = vmul.f32 %v415_v49, %v155_v48  ;;  %vm163_vm5 = vweird.f32 %v415_v49 }
 0x1a1   :  { %vm164_vm7 = vmor %vm162_vm6, %vm163_vm5 }
 0x1a2   :  { %v158_v51 = vmul.f32 %v415_v49, %v157_v50 }
 0x1a4   :  { %v159_v52 = vmul.f32 0.5, %v158_v51 }
 0x1a6   :  { %v160_v53 = vsub.f32 1.5, %v159_v52 }
 0x1a8   :  { %v161_v54 = vmul.f32 %v415_v49, %v160_v53 }
 0x1aa   :  { %v165_v57 = vsel %vm164_vm7, %v415_v49, %v161_v54 }
 0x1ab   :  { %v166_v58 = vmul.f32 %v165_v57, %v154_v55  ;;  %v81_v55 = vld [vmem:[%s552_s8 + $0x8] sm:$0x3]  ;;  %v289_v57 = vperm.slane %v505_v20, 7 }
 0x1ad   :  { %v168_v60 = vmul.f32 %v167_v56, %v166_v58 }
 0x1af   :  { %v170_v61 = vadd.f32 %v169_v59, %v168_v60  ;;  %v291_v60 = vperm.slane %v81_v55, 0 }
 0x1b1   :  { %vm171_vm8 = vcmp.gt.f32.partialorder %v170_v61, 0.0  ;;  %v172_v62 = vmul.f32 0.2, %v170_v61 }
 0x1b3   :  { %v173_v63 = vsel %vm171_vm8, %v170_v61, %v172_v62 }
 0x1b4   :  { %354 = vmatmul.msk.f32.vlgmr.msra.gmra.mxu2 %vm135_vm3, %v173_v63 }
 0x237   :  { %v195_v1 = vpop.f32.mrf.mxu2 }
 0x238   :  { %v196_v2 = vadd.f32 %v195_v1, %v174_v0  ;;  %v296_v1 = vperm.slane %v81_v55, 1 }
 0x23a   :  { %v198_v3 = vmul.f32 0.5, %v196_v2 }
 0x23c   :  { %v199_v4 = vmul.f32 1.442695, %v198_v3 }
 0x23e   :  { %416 = vpow2.f32 %v199_v4 }
 0x23f   :  { %418 = vrcp.f32 %v429_v29 }
 0x244   :  { %v417_v5 = vpop.eup %416 }
 0x245   :  { %202 = vrot.lane.b32.xlu1 %v417_v5, %s427_s4  ;;  %v419_v30 = vpop.eup %418 }
 0x246   :  { %v262_v31 = vmul.f32 32.0, %v419_v30  ;;  %vm266_vm10 = vweird.f32 %v419_v30 }
 0x248   :  { %v263_v32 = vsub.f32 1.0, %v262_v31 }
 0x24a   :  { %v264_v33 = vmul.f32 %v419_v30, %v263_v32 }
 0x24c   :  { %v265_v34 = vadd.f32 %v419_v30, %v264_v33 }
 0x24e   :  { %v267_v40 = vsel %vm266_vm10, %v419_v30, %v265_v34 }
 0x2b7   :  { %v203_v13 = vpop.permute.xlu1 %202 }
 0x2b8   :  { %v205_v14 = vmul.f32 %v203_v13, %v35_v12 }
 0x2ba   :  { %v206_v15 = vadd.f32 %v205_v14, %v196_v2 }
 0x2bc   :  { %355 = vmatmul.msk.f32.vlgmr.msra.gmra.mxu3 %vm135_vm3, %v206_v15 }
 0x33f   :  { %v228_v18 = vpop.f32.mrf.mxu3 }
 0x340   :  { %v229_v19 = vadd.f32 %v228_v18, %v207_v17 }
 0x342   :  { %vm231_vm9 = vcmp.gt.f32.partialorder %v229_v19, 0.0  ;;  %v232_v21 = vmul.f32 0.2, %v229_v19 }
 0x344   :  { %v233_v22 = vsel %vm231_vm9, %v229_v19, %v232_v21 }
 0x345   :  { %356 = vmatmul.msk.f32.vlgmr.msrb.gmra.mxu2 %vm135_vm3, %v233_v22 }
 0x3c8   :  { %v255_v24 = vpop.f32.mrf.mxu2 }
 0x3c9   :  { %v256_v25 = vadd.f32 %v255_v24, %v234_v23 }
 0x3cb   :  { %v258_v26 = vsel %vm111_vm2, %v256_v25, 0.0  ;;  %v269_v27 = vmul.f32 %v256_v25, %v256_v25 }
 0x3cc   :  { %259 = vadd.xlane.f32.xlu1 %v258_v26 }
 0x3cd   :  { %v270_v28 = vsel %vm111_vm2, %v269_v27, 0.0 }
 0x3ce   :  { %271 = vadd.xlane.f32.xlu2 %v270_v28 }
 0x3e6   :  { %340 = vrot.lane.b32.xlu2 %v196_v2, %s428_s1 }
 0x43f   :  { %v260_v42 = vpop.xlane.xlu1 %259 }
 0x440   :  { %v268_v43 = vmul.f32 %v267_v40, %v260_v42 }
 0x441   :  { %v272_v44 = vpop.xlane.xlu2 %271 }
 0x442   :  { %v274_v45 = vmul.f32 %v268_v43, %v268_v43  ;;  %v273_v46 = vmul.f32 %v272_v44, %v267_v40  ;;  %v276_v56 = vsub.f32 %v256_v25, %v268_v43 }
 0x444   :  { %v275_v47 = vsub.f32 %v273_v46, %v274_v45 }
 0x446   :  { %v277_v48 = vadd.f32 1e-05, %v275_v47 }
 0x448   :  { %420 = vrsqrt.f32 %v277_v48  ;;  %vm284_vm12 = vweird.f32 %v277_v48 }
 0x449   :  { %v341_v15 = vpop.permute.xlu2 %340 }
 0x44e   :  { %v421_v49 = vpop.eup %420 }
 0x44f   :  { %v279_v50 = vmul.f32 %v421_v49, %v277_v48  ;;  %vm285_vm11 = vweird.f32 %v421_v49 }
 0x450   :  { %vm286_vm13 = vmor %vm284_vm12, %vm285_vm11 }
 0x451   :  { %v280_v51 = vmul.f32 %v421_v49, %v279_v50 }
 0x453   :  { %v281_v52 = vmul.f32 0.5, %v280_v51 }
 0x455   :  { %v282_v53 = vsub.f32 1.5, %v281_v52 }
 0x457   :  { %v283_v54 = vmul.f32 %v421_v49, %v282_v53 }
 0x459   :  { %v287_v58 = vsel %vm286_vm13, %v421_v49, %v283_v54 }
 0x45a   :  { %v288_v59 = vmul.f32 %v287_v58, %v276_v56 }
 0x45c   :  { %v290_v61 = vmul.f32 %v289_v57, %v288_v59 }
 0x45e   :  { %v292_v62 = vadd.f32 %v291_v60, %v290_v61 }
 0x460   :  { %vm293_vm14 = vcmp.gt.f32.partialorder %v292_v62, 0.0  ;;  %v294_v63 = vmul.f32 0.2, %v292_v62 }
 0x462   :  { %v295_v0 = vsel %vm293_vm14, %v292_v62, %v294_v63 }
 0x463   :  { %357 = vmatmul.msk.f32.vlgmr.msrb.gmra.mxu3 %vm111_vm2, %v295_v0 }
 0x4e6   :  { %v317_v2 = vpop.f32.mrf.mxu3 }
 0x4e7   :  { %v318_v3 = vadd.f32 %v317_v2, %v296_v1 }
 0x4e9   :  { %v358_v4 = vmul.f32 -1.442695, %v318_v3 }
 0x4eb   :  { %422 = vpow2.f32 %v358_v4 }
 0x4f1   :  { %v423_v5 = vpop.eup %422 }
 0x4f2   :  { %v323_v6 = vadd.f32 1.0, %v423_v5 }
 0x4f4   :  { %424 = vrcp.f32 %v323_v6  ;;  %v335_v9 = vand.u32 2147483648, %v323_v6  ;;  %v333_v11 = vand.u32 2147483647, %v323_v6  ;;  %vm329_vm1 = vweird.f32 %v323_v6 }
 0x4f6   :  { %v336_v13 = vor.u32 1.1754944e-38, %v335_v9  ;;  %vm334_vm2 = vcmp.eq.f32.partialorder %v333_v11, 8.507059e+37 }
 0x4fa   :  { %v425_v7 = vpop.eup %424 }
 0x4fb   :  { %v325_v20 = vmul.f32 %v425_v7, %v323_v6  ;;  %vm330_vm15 = vweird.f32 %v425_v7 }
 0x4fc   :  { %vm331_vm3 = vmor %vm329_vm1, %vm330_vm15 }
 0x4fd   :  { %v326_v8 = vsub.f32 1.0, %v325_v20 }
 0x4ff   :  { %v327_v10 = vmul.f32 %v425_v7, %v326_v8 }
 0x501   :  { %v328_v12 = vadd.f32 %v425_v7, %v327_v10 }
 0x503   :  { %v332_v14 = vsel %vm331_vm3, %v425_v7, %v328_v12 }
 0x504   :  { %v337_v16 = vsel %vm334_vm2, %v336_v13, %v332_v14 }
 0x505   :  { %v343_v17 = vsel %vm83_vm0, %v337_v16, %v341_v15 }
 0x506   :  { %v345_v18 = vsel %vm344_vm4, %v343_v17, 0.0 }
 0x507   :  { %v346_v19 = vpack.c.bf16 %v345_v18, %v345_v18 }
 0x509   :  { %347 = vst [vmem:[%s558_s9] sm:$0xf] %v346_v19 }

</bundles_post_ra>
